<compile_context>
chip_gen: v6e
topology: v6e:2x2x1
jax: 0.10.0
libtpu: 0.0.40
codegen_flags: <defaults>
</compile_context>

<pallas_src>
import functools

import jax
import jax.numpy as jnp
from jax import lax
from jax.experimental import pallas as pl
from jax.experimental.pallas import tpu as pltpu


def mlp_critic_kernel(obs_ref, w1_ref, b1_ref, w2_ref, b2_ref, w3_ref, b3_ref,
                      out_ref, *, feature_major, bf16_act):
    """One batch tile of the critic MLP. Batch sits on the lane axis."""
    act_dtype = jnp.bfloat16 if bf16_act else jnp.float32
    x = obs_ref[...]                                   # bf16

    if feature_major:
        # x: (obs_dim, TM) -> plain MXU matmul, no transpose needed.
        h = jnp.dot(w1_ref[...], x, preferred_element_type=jnp.float32)
    else:
        # x: (TM, obs_dim); contract on obs_dim: (h1, obs_dim) x (TM, obs_dim)^T.
        h = lax.dot_general(
            w1_ref[...], x,
            dimension_numbers=(((1,), (1,)), ((), ())),
            preferred_element_type=jnp.float32)        # (h1, TM)

    h = jnp.tanh((h + b1_ref[...]).astype(act_dtype))  # (h1, TM)

    # Layer 2: (h2, h1) @ (h1, TM) -> (h2, TM), f32 accumulation.
    h = jnp.dot(w2_ref[...], h.astype(jnp.bfloat16),
                preferred_element_type=jnp.float32)
    h = jnp.tanh((h + b2_ref[...]).astype(act_dtype))  # (h2, TM)

    # Output layer (fan_out = 1): VPU multiply + sublane reduction instead of a
    # degenerate 1-row MXU matmul. w3 is stored as an (h2, 1) column.
    v = (jnp.sum(h.astype(jnp.float32) * w3_ref[...], axis=0, keepdims=True)
         + b3_ref[...])                                # (1, TM), lane-dense

    out_ref[...] = v.astype(out_ref.dtype)


def _round_up(x, m):
    return (x + m - 1) // m * m


def _default_bf16_act():
    """bf16 tanh/bias only where the VPU/EUP support bf16 (v6e / v7x)."""
    try:
        kind = jax.devices()[0].device_kind.lower()
    except Exception:  # pragma: no cover - conservative fallback
        return False
    return ("v6" in kind) or ("v7" in kind) or ("7x" in kind)


def _select_tile_m(batch, obs_dim, itemsize, tm_cap):
    """Lane-aligned batch tile: big enough to amortize the ~0.35us/step grid
    overhead, small enough to fit VMEM and leave >=2 steps for v7x megacore."""
    lane = 128
    if batch <= 256:
        return _round_up(batch, lane)          # single lane-dense tile
    # VMEM budget for the double-buffered obs tile (the only tile that scales).
    vmem_budget = 8 << 20
    by_vmem = max(lane, (vmem_budget // (2 * obs_dim * itemsize)) // lane * lane)
    # Keep at least 2 grid steps so the "parallel" batch axis can be sharded
    # across v7x's two TensorCores.
    half = _round_up((batch + 1) // 2, lane)
    return max(lane, min(tm_cap, by_vmem, half))


def mlp_critic_forward(obs, params, *, tm_cap=2048, bf16_act=None,
                       feature_major=False):
    """MLPCritic forward.

    obs: (batch, obs_dim)  (or (obs_dim, batch) if feature_major=True)
    returns: values, shape (batch,)
    """
    w1, b1, w2, b2, w3, b3 = params
    if bf16_act is None:
        bf16_act = _default_bf16_act()

    if obs.dtype != jnp.bfloat16:
        # In production the producer should emit bf16 obs directly; the MXU
        # operand is bf16 anyway, so this halves the kernel's HBM read bytes.
        obs = obs.astype(jnp.bfloat16)

    if feature_major:
        obs_dim, batch = obs.shape
    else:
        batch, obs_dim = obs.shape
    h1_dim = w1.shape[0]
    h2_dim = w2.shape[0]

    tile_m = _select_tile_m(batch, obs_dim, obs.dtype.itemsize, tm_cap)
    assert tile_m % 128 == 0
    padded = _round_up(batch, tile_m)
    if padded != batch:
        pad = padded - batch
        pad_width = ((0, 0), (0, pad)) if feature_major else ((0, pad), (0, 0))
        obs = jnp.pad(obs, pad_width)
    grid = (padded // tile_m,)

    if feature_major:
        obs_spec = pl.BlockSpec((obs_dim, tile_m), lambda i: (0, i))
    else:
        obs_spec = pl.BlockSpec((tile_m, obs_dim), lambda i: (i, 0))
    const = lambda i: (0, 0)  # weights/biases: same block every step -> resident

    param_bytes = sum(int(p.size) * p.dtype.itemsize for p in params)
    cost = pl.CostEstimate(
        flops=2 * padded * (obs_dim * h1_dim + h1_dim * h2_dim + h2_dim),
        transcendentals=padded * (h1_dim + h2_dim),
        bytes_accessed=int(obs.size * obs.dtype.itemsize) + padded * 4
                       + param_bytes,
    )

    # Explicit VMEM limit from the real footprint (double-buffered obs/out
    # tiles + resident params), clamped to [32 MiB default, 64 MiB v7x phys].
    footprint = (2 * tile_m * obs_dim * obs.dtype.itemsize
                 + 2 * tile_m * 4
                 + 2 * param_bytes)
    vmem_limit = int(min(64 << 20, max(32 << 20, 2 * footprint + (4 << 20))))

    kernel = functools.partial(mlp_critic_kernel,
                               feature_major=feature_major,
                               bf16_act=bf16_act)

    out = pl.pallas_call(
        kernel,
        out_shape=jax.ShapeDtypeStruct((1, padded), jnp.float32),
        grid=grid,
        in_specs=[obs_spec,
                  pl.BlockSpec(w1.shape, const),
                  pl.BlockSpec(b1.shape, const),
                  pl.BlockSpec(w2.shape, const),
                  pl.BlockSpec(b2.shape, const),
                  pl.BlockSpec(w3.shape, const),
                  pl.BlockSpec(b3.shape, const)],
        out_specs=pl.BlockSpec((1, tile_m), lambda i: (0, i)),
        compiler_params=pltpu.CompilerParams(
            dimension_semantics=("parallel",),
            vmem_limit_bytes=vmem_limit),
        cost_estimate=cost,
    )(obs, w1, b1, w2, b2, w3, b3)

    # torch.squeeze(v, -1): (1, padded) lane-dense slab -> (batch,)
    return out[0, :batch]


def init_mlp_critic_params(key, obs_dim, hidden_sizes):
    """Torch-nn.Linear-style init (U[-1/sqrt(in), 1/sqrt(in)]).

    Storage layouts (kernel-friendly):
      w1: (h1, obs_dim) bf16   b1: (h1, 1) f32
      w2: (h2, h1)      bf16   b2: (h2, 1) f32
      w3: (h2, 1)       f32    b3: (1, 1)  f32   (last layer stored as a column)
    """
    h1, h2 = hidden_sizes

    def linear(k, fan_in, fan_out):
        wk, bk = jax.random.split(k)
        bound = 1.0 / (float(fan_in) ** 0.5)
        w = jax.random.uniform(wk, (fan_out, fan_in), jnp.float32,
                               minval=-bound, maxval=bound)
        b = jax.random.uniform(bk, (fan_out, 1), jnp.float32,
                               minval=-bound, maxval=bound)
        return w, b

    k1, k2, k3 = jax.random.split(key, 3)
    w1, b1 = linear(k1, obs_dim, h1)
    w2, b2 = linear(k2, h1, h2)
    w3, b3 = linear(k3, h2, 1)
    return (w1.astype(jnp.bfloat16), b1,
            w2.astype(jnp.bfloat16), b2,
            w3.T.astype(jnp.float32),   # (h2, 1)
            b3)                          # (1, 1)


def mlp_critic_reference(obs, params, *, bf16_act):
    """Pure-JAX reference mirroring the kernel's precision choices."""
    w1, b1, w2, b2, w3, b3 = params
    act = jnp.bfloat16 if bf16_act else jnp.float32
    x = obs.astype(jnp.bfloat16)
    h = lax.dot_general(w1, x, (((1,), (1,)), ((), ())),
                        preferred_element_type=jnp.float32)
    h = jnp.tanh((h + b1).astype(act))
    h = jnp.dot(w2, h.astype(jnp.bfloat16), preferred_element_type=jnp.float32)
    h = jnp.tanh((h + b2).astype(act))
    v = jnp.sum(h.astype(jnp.float32) * w3, axis=0, keepdims=True) + b3
    return v[0]


if __name__ == "__main__":
    key = jax.random.PRNGKey(0)
    k_obs, k_params, k_obs2 = jax.random.split(key, 3)

    batch = 8
    obs_dim = 32
    hidden_sizes = (32, 32)   # activation = Tanh

    params = init_mlp_critic_params(k_params, obs_dim, hidden_sizes)
    bf16_act = _default_bf16_act()
    atol = rtol = (5e-2 if bf16_act else 2e-3)

    # Small single-tile case (matches the toy module shapes).
    obs = jax.random.normal(k_obs, (batch, obs_dim), jnp.float32)
    v = jax.block_until_ready(mlp_critic_forward(obs, params))
    v_ref = mlp_critic_reference(obs, params, bf16_act=bf16_act)
    assert v.shape == (batch,), f"unexpected output shape {v.shape}"
    assert jnp.allclose(v, v_ref, atol=atol, rtol=rtol), "mismatch vs reference"

    # Gridded case: >=2 grid steps (v7x megacore), batch tiling, padding,
    # resident weights.
    obs2 = jax.random.normal(k_obs2, (300, obs_dim), jnp.float32)
    v2 = jax.block_until_ready(mlp_critic_forward(obs2, params))
    v2_ref = mlp_critic_reference(obs2, params, bf16_act=bf16_act)
    assert v2.shape == (300,), f"unexpected output shape {v2.shape}"
    assert jnp.allclose(v2, v2_ref, atol=atol, rtol=rtol), "mismatch (tiled)"

    # Feature-major obs ((obs_dim, batch)): lane-dense input tile and no
    # per-step X^T transpose in layer 1.
    v3 = jax.block_until_ready(
        mlp_critic_forward(obs2.T, params, feature_major=True))
    assert v3.shape == (300,), f"unexpected output shape {v3.shape}"
    assert jnp.allclose(v3, v2_ref, atol=atol, rtol=rtol), "mismatch (fmajor)"

    print("KERNEL_OK")
</pallas_src>

<mosaic_0001>
module attributes {stable_mosaic.version = 11 : i64} {
  func.func @mlp_critic_kernel(%arg0: i32, %arg1: memref<128x32xbf16, #tpu.memory_space<vmem>>, %arg2: memref<32x32xbf16, #tpu.memory_space<vmem>>, %arg3: memref<32x1xf32, #tpu.memory_space<vmem>>, %arg4: memref<32x32xbf16, #tpu.memory_space<vmem>>, %arg5: memref<32x1xf32, #tpu.memory_space<vmem>>, %arg6: memref<32x1xf32, #tpu.memory_space<vmem>>, %arg7: memref<1x1xf32, #tpu.memory_space<vmem>>, %arg8: memref<1x128xf32, #tpu.memory_space<vmem>>) attributes {dimension_semantics = [#tpu.dimension_semantics<parallel>], iteration_bounds = array<i64: 1>, scalar_prefetch = 0 : i64, scratch_operands = 0 : i64, tpu.core_type = #tpu.core_type<tc>, window_params = [{transform_indices = @transform_0, window_bounds = array<i64: 128, 32>}, {pipeline_mode = #tpu.pipeline_mode<synchronous>, transform_indices = @transform_1, window_bounds = array<i64: 32, 32>}, {pipeline_mode = #tpu.pipeline_mode<synchronous>, transform_indices = @transform_2, window_bounds = array<i64: 32, 1>}, {pipeline_mode = #tpu.pipeline_mode<synchronous>, transform_indices = @transform_3, window_bounds = array<i64: 32, 32>}, {pipeline_mode = #tpu.pipeline_mode<synchronous>, transform_indices = @transform_4, window_bounds = array<i64: 32, 1>}, {pipeline_mode = #tpu.pipeline_mode<synchronous>, transform_indices = @transform_5, window_bounds = array<i64: 32, 1>}, {pipeline_mode = #tpu.pipeline_mode<synchronous>, transform_indices = @transform_6, window_bounds = array<i64: 1, 1>}, {transform_indices = @transform_7, window_bounds = array<i64: 1, 128>}]} {
    %c0 = arith.constant 0 : index
    %c0_0 = arith.constant 0 : index
    %0 = vector.load %arg1[%c0, %c0_0] : memref<128x32xbf16, #tpu.memory_space<vmem>>, vector<128x32xbf16>
    %c0_1 = arith.constant 0 : index
    %c0_2 = arith.constant 0 : index
    %1 = vector.load %arg2[%c0_1, %c0_2] : memref<32x32xbf16, #tpu.memory_space<vmem>>, vector<32x32xbf16>
    %cst = arith.constant dense<0.000000e+00> : vector<32x128xf32>
    %2 = tpu.matmul %1, %0, %cst {dimension_numbers = #tpu.dot_dimension_numbers<[1], [1], [0], [0], [0, 0, 1, 0], [], []>} : vector<32x32xbf16>, vector<128x32xbf16>, vector<32x128xf32> -> vector<32x128xf32>
    %c0_3 = arith.constant 0 : index
    %c0_4 = arith.constant 0 : index
    %3 = vector.load %arg3[%c0_3, %c0_4] : memref<32x1xf32, #tpu.memory_space<vmem>>, vector<32x1xf32>
    %4 = vector.broadcast %3 : vector<32x1xf32> to vector<32x128xf32>
    %5 = arith.addf %2, %4 : vector<32x128xf32>
    %6 = math.tanh %5 : vector<32x128xf32>
    %c0_5 = arith.constant 0 : index
    %c0_6 = arith.constant 0 : index
    %7 = vector.load %arg4[%c0_5, %c0_6] : memref<32x32xbf16, #tpu.memory_space<vmem>>, vector<32x32xbf16>
    %8 = arith.truncf %6 : vector<32x128xf32> to vector<32x128xbf16>
    %cst_7 = arith.constant dense<0.000000e+00> : vector<32x128xf32>
    %9 = tpu.matmul %7, %8, %cst_7 {dimension_numbers = #tpu.dot_dimension_numbers<[1], [0], [0], [1], [0, 0, 1, 1], [], []>} : vector<32x32xbf16>, vector<32x128xbf16>, vector<32x128xf32> -> vector<32x128xf32>
    %c0_8 = arith.constant 0 : index
    %c0_9 = arith.constant 0 : index
    %10 = vector.load %arg5[%c0_8, %c0_9] : memref<32x1xf32, #tpu.memory_space<vmem>>, vector<32x1xf32>
    %11 = vector.broadcast %10 : vector<32x1xf32> to vector<32x128xf32>
    %12 = arith.addf %9, %11 : vector<32x128xf32>
    %13 = math.tanh %12 : vector<32x128xf32>
    %c0_10 = arith.constant 0 : index
    %c0_11 = arith.constant 0 : index
    %14 = vector.load %arg6[%c0_10, %c0_11] : memref<32x1xf32, #tpu.memory_space<vmem>>, vector<32x1xf32>
    %15 = vector.broadcast %14 : vector<32x1xf32> to vector<32x128xf32>
    %16 = arith.mulf %13, %15 : vector<32x128xf32>
    %cst_12 = arith.constant dense<0.000000e+00> : vector<128xf32>
    %17 = vector.multi_reduction <add>, %16, %cst_12 [0] : vector<32x128xf32> to vector<128xf32>
    %18 = vector.shape_cast %17 : vector<128xf32> to vector<1x128xf32>
    %c0_13 = arith.constant 0 : index
    %c0_14 = arith.constant 0 : index
    %19 = vector.load %arg7[%c0_13, %c0_14] : memref<1x1xf32, #tpu.memory_space<vmem>>, vector<1x1xf32>
    %20 = vector.broadcast %19 : vector<1x1xf32> to vector<1x128xf32>
    %21 = arith.addf %18, %20 : vector<1x128xf32>
    %c0_15 = arith.constant 0 : index
    %c0_16 = arith.constant 0 : index
    %22 = vector.load %arg8[%c0_15, %c0_16] : memref<1x128xf32, #tpu.memory_space<vmem>>, vector<1x128xf32>
    tpu.vector_store %arg8[%c0_15, %c0_16], %21 {strides = array<i32>} : memref<1x128xf32, #tpu.memory_space<vmem>>, vector<1x128xf32>,
    return
  }
  func.func @transform_0(%arg0: i32) -> (i32, i32) {
    %c0_i32 = arith.constant 0 : i32
    %c0_i32_0 = arith.constant 0 : i32
    return %arg0, %c0_i32 : i32, i32
  }
  func.func @transform_1(%arg0: i32) -> (i32, i32) {
    %c0_i32 = arith.constant 0 : i32
    %c0_i32_0 = arith.constant 0 : i32
    %c0_i32_1 = arith.constant 0 : i32
    return %c0_i32, %c0_i32_0 : i32, i32
  }
  func.func @transform_2(%arg0: i32) -> (i32, i32) {
    %c0_i32 = arith.constant 0 : i32
    %c0_i32_0 = arith.constant 0 : i32
    %c0_i32_1 = arith.constant 0 : i32
    return %c0_i32, %c0_i32_0 : i32, i32
  }
  func.func @transform_3(%arg0: i32) -> (i32, i32) {
    %c0_i32 = arith.constant 0 : i32
    %c0_i32_0 = arith.constant 0 : i32
    %c0_i32_1 = arith.constant 0 : i32
    return %c0_i32, %c0_i32_0 : i32, i32
  }
  func.func @transform_4(%arg0: i32) -> (i32, i32) {
    %c0_i32 = arith.constant 0 : i32
    %c0_i32_0 = arith.constant 0 : i32
    %c0_i32_1 = arith.constant 0 : i32
    return %c0_i32, %c0_i32_0 : i32, i32
  }
  func.func @transform_5(%arg0: i32) -> (i32, i32) {
    %c0_i32 = arith.constant 0 : i32
    %c0_i32_0 = arith.constant 0 : i32
    %c0_i32_1 = arith.constant 0 : i32
    return %c0_i32, %c0_i32_0 : i32, i32
  }
  func.func @transform_6(%arg0: i32) -> (i32, i32) {
    %c0_i32 = arith.constant 0 : i32
    %c0_i32_0 = arith.constant 0 : i32
    %c0_i32_1 = arith.constant 0 : i32
    return %c0_i32, %c0_i32_0 : i32, i32
  }
  func.func @transform_7(%arg0: i32) -> (i32, i32) {
    %c0_i32 = arith.constant 0 : i32
    %c0_i32_0 = arith.constant 0 : i32
    return %c0_i32, %arg0 : i32, i32
  }
}

</mosaic_0001>

<bundles_post_ra>
// kernel: tpu_custom_call.1
= control target key start
LH: loop header
LB: loop body
LE: loop exit
PB: predicated region body
PF: predicated region fallthrough
CT: control target
= control target key end

     0   :  { %s630_s0 = inlined_call_operand.vmem [shape: bf16[128,32], index: 0, kind: input, shape index: {}]   ;;  %s631_s1 = inlined_call_operand.vmem [shape: bf16[32,32], index: 1, kind: input, shape index: {}]   ;;  %s632_s2 = inlined_call_operand.vmem [shape: f32[32,1], index: 2, kind: input, shape index: {}]   ;;  %s633_s3 = inlined_call_operand.vmem [shape: bf16[32,32], index: 3, kind: input, shape index: {}]   ;;  %s634_s4 = inlined_call_operand.vmem [shape: f32[32,1], index: 4, kind: input, shape index: {}]   ;;  %s635_s5 = inlined_call_operand.vmem [shape: f32[32,1], index: 5, kind: input, shape index: {}]   ;;  %s636_s6 = inlined_call_operand.<no memory space> [shape: f32[1,1], index: 6, kind: input, shape index: {}]   ;;  %s637_s7 = inlined_call_operand.hbm [shape: f32[1,128], index: 7, kind: output, shape index: {}]  }
   0x1   :  { %v12_v0 = vstv %s636_s6 }
   0x2   :  { %13 = vst [vmem:[#allocation2] sm:$0x1] %v12_v0 }
   0x3   :  { %v440_v1 = vld [vmem:[%s630_s0 + $0x38] sm:$0xff]   ;;  %vm124_vm0 = vcmask 261120   ;;  %v441_v2 = vld [vmem:[%s630_s0 + $0x30] sm:$0xff]   ;;  %v490_v4 = vmov 0   ;;  %v442_v5 = vld [vmem:[%s630_s0 + $0x28] sm:$0xff]  }
   0x4   :  { %428 = vmatprep.subr.msk.bf16.mxu0 %vm124_vm0, %v440_v1  ;;  %v153_v3 = vsel %vm124_vm0, %v440_v1, 0  ;;  %438 = vset.pattern.permute.xlu0 %v490_v4  ;;  %v150_v6 = vsel %vm124_vm0, %v441_v2, 0  ;;  %v448_v7 = vld [vmem:[%s631_s1] sm:$0xff]   ;;  %v52_v8 = vld [vmem:[%s632_s2 + $0x10] sm:$0xff]  ;;  %v53_v10 = vld [vmem:[%s632_s2 + $0x18] sm:$0xff] }
   0x5   :  { %401 = vmatpush3.bf16.xpose.msra.mxu0 %v153_v3  ;;  %439 = vset.pattern.permute.xlu1 %v490_v4  ;;  %v50_v9 = vld [vmem:[%s632_s2] sm:$0xff]  ;;  %v51_v11 = vld [vmem:[%s632_s2 + $0x8] sm:$0xff] }
   0x6   :  { %429 = vmatprep.subr.msk.bf16.mxu0 %vm124_vm0, %v441_v2  ;;  %416 = vmatprep.mubr.msk.bf16.mxu0 %vm124_vm0, %v448_v7 }
   0x7   :  { %66 = vperm.xlu0 %438, %v52_v8   ;;  %56 = vperm.xlu1 %439, %v50_v9  }
   0xb   :  { %71 = vperm.xlu0 %438, %v53_v10  }
   0xd   :  { %403 = vmatpush3.bf16.xpose.msra.mxu0 %v150_v6 }
   0xe   :  { %430 = vmatprep.subr.msk.bf16.mxu0 %vm124_vm0, %v442_v5 }
   0xf   :  { %14 = vsyncpa [#allocation4], 0  ;;  %v147_v12 = vsel %vm124_vm0, %v442_v5, 0  ;;  %v443_v13 = vld [vmem:[%s630_s0 + $0x20] sm:$0xff]   ;;  %61 = vperm.xlu1 %439, %v51_v11   ;;  %v215_v15 = vld [vmem:[%s634_s4 + $0x8] sm:$0xff] }
  0x10   :  { %v214_v14 = vld [vmem:[%s634_s4] sm:$0xff]  ;;  %v216_v16 = vld [vmem:[%s634_s4 + $0x10] sm:$0xff]  ;;  %v217_v17 = vld [vmem:[%s634_s4 + $0x18] sm:$0xff]  ;;  %v144_v18 = vsel %vm124_vm0, %v443_v13, 0 }
  0x11   :  { %220 = vperm.xlu0 %438, %v214_v14   ;;  %v444_v19 = vld [vmem:[%s630_s0 + $0x18] sm:$0xff]   ;;  %v307_v20 = vld [vmem:[%s635_s5] sm:$0xff]  ;;  %v308_v21 = vld [vmem:[%s635_s5 + $0x8] sm:$0xff] }
  0x12   :  { %v309_v22 = vld [vmem:[%s635_s5 + $0x10] sm:$0xff]  ;;  %v310_v23 = vld [vmem:[%s635_s5 + $0x18] sm:$0xff]  ;;  %v141_v24 = vsel %vm124_vm0, %v444_v19, 0  ;;  %v344_v26 = vld [vmem:[#allocation2] sm:$0x1] }
  0x13   :  { %225 = vperm.xlu1 %439, %v215_v15   ;;  %v445_v25 = vld [vmem:[%s630_s0 + $0x10] sm:$0xff]   ;;  %v446_v28 = vld [vmem:[%s630_s0 + $0x8] sm:$0xff]   ;;  %v447_v30 = vld [vmem:[%s630_s0] sm:$0xff]   ;;  %v350_v15 = vlaneseq }
  0x14   :  { %v138_v27 = vsel %vm124_vm0, %v445_v25, 0  ;;  %v135_v29 = vsel %vm124_vm0, %v446_v28, 0  ;;  %v132_v31 = vsel %vm124_vm0, %v447_v30, 0  ;;  %v449_v32 = vld [vmem:[%s631_s1 + $0x8] sm:$0xff]   ;;  %v450_v33 = vld [vmem:[%s633_s3] sm:$0xff]  }
  0x15   :  { %405 = vmatpush3.bf16.xpose.msra.mxu0 %v147_v12  ;;  %230 = vperm.xlu0 %438, %v216_v16   ;;  %v451_v52 = vld [vmem:[%s633_s3 + $0x8] sm:$0xff]   ;;  %s491_s3 = smov [#allocation3]  }
  0x16   :  { %431 = vmatprep.subr.msk.bf16.mxu0 %vm124_vm0, %v443_v13  ;;  %424 = vmatprep.mubr.msk.bf16.mxu1 %vm124_vm0, %v450_v33  ;;  %s362_s21 = sshll.u32 %s491_s3, 4  ;;  %s363_s21 = int_to_ptr.vmem [resolvable:$true] %s362_s21 }
  0x17   :  { %235 = vperm.xlu1 %439, %v217_v17   ;;  %s468_s22 = scalar_lea.vmem %s363_s21, 16  ;;  %s472_s23 = scalar_lea.vmem %s363_s21, 32 }
  0x18   :  { %p469_p0 = scmp.ne.s32.totalorder %s363_s21, %s468_s22  ;;  %p473_p1 = scmp.lt.s32.totalorder %s363_s21, %s363_s21 }
  0x19   :  { %313 = vperm.xlu0 %438, %v307_v20   ;;  %p474_p2 = scmp.lt.s32.totalorder %s472_s23, %s468_s22 }
  0x1b   :  { %318 = vperm.xlu1 %439, %v308_v21   ;;  %p475_p3 = por %p474_p2, %p473_p1 }
  0x1d   :  { %407 = vmatpush3.bf16.xpose.msra.mxu0 %v144_v18  ;;  %323 = vperm.xlu0 %438, %v309_v22   ;;  %v351_v18 = vshrl.u32 %v350_v15, 7  ;;  %p476_p4 = pnand %p475_p3, %p469_p0 }
  0x1e   :  { %432 = vmatprep.subr.msk.bf16.mxu0 %vm124_vm0, %v444_v19 }
  0x1f   :  { %328 = vperm.xlu1 %439, %v310_v23   ;;  %v352_v21 = vsub.s32 0, %v351_v18 }
  0x21   :  { %347 = vperm.xlu0 %438, %v344_v26  }
  0x25   :  { %409 = vmatpush3.bf16.xpose.msra.mxu0 %v141_v24 }
  0x26   :  { %433 = vmatprep.subr.msk.bf16.mxu0 %vm124_vm0, %v445_v25 }
  0x2d   :  { %411 = vmatpush3.bf16.xpose.msra.mxu0 %v138_v27 }
  0x2e   :  { %434 = vmatprep.subr.msk.bf16.mxu0 %vm124_vm0, %v446_v28 }
  0x35   :  { %413 = vmatpush3.bf16.xpose.msra.mxu0 %v135_v29 }
  0x36   :  { %435 = vmatprep.subr.msk.bf16.mxu0 %vm124_vm0, %v447_v30 }
  0x3d   :  { %415 = vmatpush3.bf16.xpose.msra.mxu0 %v132_v31 }
  0x44   :  { %417 = vmatmul.mubr.msk.bf16.vlgmr.msra.gmra.mxu0 %vm124_vm0, %v449_v32 }
  0x82   :  { %v67_v34 = vpop.permute.xlu0 %66  ;;  %v57_v35 = vpop.permute.xlu1 %56 }
  0x86   :  { %v72_v39 = vpop.permute.xlu0 %71 }
  0x8a   :  { %v62_v43 = vpop.permute.xlu1 %61 }
  0x8c   :  { %v221_v53 = vpop.permute.xlu0 %220 }
  0x8e   :  { %v226_v54 = vpop.permute.xlu1 %225 }
  0x90   :  { %v231_v57 = vpop.permute.xlu0 %230 }
  0x92   :  { %v236_v61 = vpop.permute.xlu1 %235 }
  0x94   :  { %v314_v1 = vpop.permute.xlu0 %313 }
  0x96   :  { %v319_v3 = vpop.permute.xlu1 %318 }
  0x98   :  { %v324_v9 = vpop.permute.xlu0 %323 }
  0x9a   :  { %v329_v12 = vpop.permute.xlu1 %328 }
  0x9c   :  { %v348_v23 = vpop.permute.xlu0 %347 }
  0x9d   :  { %v353_v25 = vrot.slane %v348_v23, %v352_v21 }
 0x104   :  { %v418_v36 = vpop.f32.mrf.mxu0 }
 0x105   :  { %v198_v37 = vadd.f32 %v418_v36, %v67_v34 }
 0x106   :  { %v189_v38 = vpop.f32.mrf.mxu0 }
 0x107   :  { %v190_v40 = vadd.f32 %v189_v38, %v57_v35  ;;  %452 = vtanh.f32 %v198_v37 }
 0x108   :  { %v419_v41 = vpop.f32.mrf.mxu0 }
 0x109   :  { %v201_v42 = vadd.f32 %v419_v41, %v72_v39 }
 0x10a   :  { %v192_v44 = vpop.f32.mrf.mxu0 }
 0x10b   :  { %454 = vtanh.f32 %v201_v42  ;;  %v193_v45 = vadd.f32 %v192_v44, %v62_v43 }
 0x10c   :  { %456 = vtanh.f32 %v190_v40 }
 0x10d   :  { %458 = vtanh.f32 %v193_v45 }
 0x114   :  { %v453_v46 = vpop.eup %452 }
 0x118   :  { %v455_v47 = vpop.eup %454 }
 0x119   :  { %v457_v48 = vpop.eup %456  ;;  %v213_v49 = vpack.c.bf16 %v455_v47, %v453_v46 }
 0x11a   :  { %v459_v50 = vpop.eup %458 }
 0x11b   :  { %420 = vmatprep.subr.bf16.mxu1 %v213_v49  ;;  %v212_v51 = vpack.c.bf16 %v459_v50, %v457_v48 }
 0x11c   :  { %421 = vmatpush3.bf16.msra.mxu1 %v213_v49 }
 0x11d   :  { %422 = vmatprep.subr.bf16.mxu1 %v212_v51 }
 0x120   :  { %423 = vmatpush3.bf16.msra.mxu1 %v212_v51 }
 0x123   :  { %425 = vmatmul.mubr.msk.bf16.vlgmr.msra.gmra.mxu1 %vm124_vm0, %v451_v52 }
 0x1e3   :  { %v426_v55 = vpop.f32.mrf.mxu1 }
 0x1e4   :  { %v297_v59 = vadd.f32 %v426_v55, %v231_v57 }
 0x1e5   :  { %v288_v56 = vpop.f32.mrf.mxu1 }
 0x1e6   :  { %v289_v58 = vadd.f32 %v288_v56, %v221_v53 }
 0x1e7   :  { %v427_v60 = vpop.f32.mrf.mxu1 }
 0x1e8   :  { %460 = vtanh.f32 %v289_v58  ;;  %v300_v63 = vadd.f32 %v427_v60, %v236_v61 }
 0x1e9   :  { %v291_v62 = vpop.f32.mrf.mxu1  ;;  %462 = vtanh.f32 %v297_v59 }
 0x1ea   :  { %v292_v0 = vadd.f32 %v291_v62, %v226_v54 }
 0x1ec   :  { %464 = vtanh.f32 %v292_v0 }
 0x1ed   :  { %466 = vtanh.f32 %v300_v63 }
 0x1f5   :  { %v461_v2 = vpop.eup %460 }
 0x1f6   :  { %v463_v4 = vpop.eup %462  ;;  %v331_v6 = vmul.f32 %v461_v2, %v314_v1 }
 0x1f7   :  { %v333_v10 = vmul.f32 %v463_v4, %v324_v9 }
 0x1f9   :  { %v465_v5 = vpop.eup %464 }
 0x1fa   :  { %v332_v7 = vmul.f32 %v465_v5, %v319_v3  ;;  %v467_v8 = vpop.eup %466 }
 0x1fb   :  { %v334_v13 = vmul.f32 %v467_v8, %v329_v12 }
 0x1fc   :  { %v335_v11 = vadd.f32 %v332_v7, %v331_v6 }
 0x1fe   :  { %v336_v14 = vadd.f32 %v335_v11, %v333_v10 }
 0x200   :  { %v337_v16 = vadd.f32 %v336_v14, %v334_v13 }
 0x202   :  { %v338_v17 = vrot.slane %v337_v16, 4 }
 0x204   :  { %v339_v19 = vadd.f32 %v338_v17, %v337_v16 }
 0x206   :  { %v340_v20 = vrot.slane %v339_v19, 2 }
 0x208   :  { %v341_v22 = vadd.f32 %v340_v20, %v339_v19 }
 0x20a   :  { %v342_v24 = vrot.slane %v341_v22, 1 }
 0x20c   :  { %v343_v26 = vadd.f32 %v342_v24, %v341_v22 }
 0x20e   :  { %v354_v27 = vadd.f32 %v353_v25, %v343_v26 }
 0x210   :  { %355 = vst [vmem:[#allocation3] sm:$0x1] %v354_v27 }
 0x211   :  { %479 = shalt.err (!%p476_p4)
}
 0x212   :  { %365 = dma.vmem_to_hbm [thread:$0]  %s363_s21, 16, %s637_s7, [#allocation4]  }
 0x213   :  { %488 = dma.done.wait [#allocation4], 16  }
 0x214   :  { %489 = vsyncadd [#allocation4], 4294967280 }
 0x215   :  { %369 = vsyncpa [#allocation4], 1 }

</bundles_post_ra>
